<compile_context>
chip_gen: v6e
topology: v6e:2x2x1
jax: 0.10.0
libtpu: 0.0.40
codegen_flags: <defaults>
</compile_context>

<pallas_src>
import math

import jax
import jax.numpy as jnp
from jax.experimental import pallas as pl
from jax.experimental.pallas import tpu as pltpu


def build_pe(d_model: int, max_h: int, max_w: int, dtype=jnp.float32):
    """Deterministic buffer init, same math as the PyTorch __init__."""
    half = d_model // 2
    pe = jnp.zeros((d_model, max_h, max_w), dtype)
    div_term = jnp.exp(
        jnp.arange(0, half, 2, dtype=jnp.float32) * -(math.log(10000.0) / half)
    )                                                            # (d_model//4,)
    pos_h = jnp.arange(max_h, dtype=jnp.float32)[:, None, None]  # (max_h, 1, 1)
    pos_w = jnp.arange(max_w, dtype=jnp.float32)[None, None, :]  # (1, 1, max_w)

    sin_h = jnp.transpose(jnp.sin(pos_h * div_term), (0, 2, 1))  # (max_h, d//4, 1)
    cos_h = jnp.transpose(jnp.cos(pos_h * div_term), (0, 2, 1))
    sin_w = jnp.sin(pos_w * div_term)                            # (1, 1, max_w)
    cos_w = jnp.cos(pos_w * div_term)

    pe = pe.at[0:half:2, :, :].set(jnp.broadcast_to(sin_h, pe[0:half:2].shape).astype(dtype))
    pe = pe.at[1:half:2, :, :].set(jnp.broadcast_to(cos_h, pe[1:half:2].shape).astype(dtype))
    pe = pe.at[half::2, :, :].set(jnp.broadcast_to(sin_w, pe[half::2].shape).astype(dtype))
    pe = pe.at[half + 1::2, :, :].set(jnp.broadcast_to(cos_w, pe[half + 1::2].shape).astype(dtype))
    return pe


def _add_pe_kernel(x_ref, pe_ref, o_ref):
    # x_ref, pe_ref, o_ref: identical (tc, H*W) lane-dense blocks -> pure load/add/store.
    o_ref[...] = (x_ref[...] + pe_ref[...]).astype(o_ref.dtype)


def _choose_channel_tile(C: int, HW: int, itemsize: int, max_block_bytes: int = 1 << 20) -> int:
    """Largest divisor of C that is a multiple of 8 and keeps the block <= ~1 MiB."""
    bytes_per_row = HW * itemsize
    max_rows = max(8, max_block_bytes // max(1, bytes_per_row))
    for tc in range(min(C, max_rows), 0, -1):
        if C % tc == 0 and tc % 8 == 0:
            return tc
    return C  # fallback (e.g. C not a multiple of 8); block then spans full channel dim


def positional_encoding_2d(x: jax.Array, pe: jax.Array) -> jax.Array:
    """Forward pass: x + pe[:, :H, :W] broadcast over the batch dimension."""
    B, C, H, W = x.shape
    assert C == pe.shape[0], "channel dim must equal d_model"
    HW = H * W

    # Wrapper glue: slice like `self.pe[:, :h, :w]`, cast to the compute dtype, and present
    # lane-dense 2D views (contiguous reshapes are free in HBM).
    pe_hw = pe[:, :H, :W].reshape(C, HW).astype(x.dtype)
    x2d = x.reshape(B * C, HW)

    tc = _choose_channel_tile(C, HW, jnp.dtype(x.dtype).itemsize)
    cblocks = C // tc

    out2d = pl.pallas_call(
        _add_pe_kernel,
        out_shape=jax.ShapeDtypeStruct((B * C, HW), x.dtype),
        grid=(B, cblocks),
        in_specs=[
            pl.BlockSpec((tc, HW), lambda b, c: (b * cblocks + c, 0)),  # x rows for (batch b, chan-block c)
            pl.BlockSpec((tc, HW), lambda b, c: (c, 0)),                # pe shared across batches
        ],
        out_specs=pl.BlockSpec((tc, HW), lambda b, c: (b * cblocks + c, 0)),
        input_output_aliases={0: 0},  # out reuses x's buffer (x += pe semantics)
        compiler_params=pltpu.CompilerParams(
            dimension_semantics=("parallel", "parallel"),
        ),
    )(x2d, pe_hw)

    return out2d.reshape(B, C, H, W)


if __name__ == "__main__":
    # d_model=64 so that d_model // 4 == max_h == max_w == 16 (required by the PyTorch
    # init's broadcasting). Input uses a smaller spatial extent to exercise pe[:, :h, :w].
    d_model, max_h, max_w = 64, 16, 16
    B, C, H, W = 2, d_model, 8, 16

    key = jax.random.PRNGKey(0)
    x = jax.random.normal(key, (B, C, H, W), dtype=jnp.float32)

    pe = build_pe(d_model, max_h, max_w)

    out = positional_encoding_2d(x, pe)
    out = jax.block_until_ready(out)

    # Pure-JAX reference of the forward pass.
    ref = x + pe[:, :H, :W][None, :, :, :]
    assert out.shape == x.shape and out.dtype == x.dtype
    assert jnp.allclose(out, ref, atol=1e-6, rtol=1e-6)

    print("KERNEL_OK")
</pallas_src>

<mosaic_0001>
module attributes {stable_mosaic.version = 11 : i64} {
  func.func @_add_pe_kernel(%arg0: i32, %arg1: i32, %arg2: memref<64x128xf32, #tpu.memory_space<vmem>>, %arg3: memref<64x128xf32, #tpu.memory_space<vmem>>, %arg4: memref<64x128xf32, #tpu.memory_space<vmem>>) attributes {dimension_semantics = [#tpu.dimension_semantics<parallel>, #tpu.dimension_semantics<parallel>], iteration_bounds = array<i64: 2, 1>, scalar_prefetch = 0 : i64, scratch_operands = 0 : i64, tpu.core_type = #tpu.core_type<tc>, window_params = [{transform_indices = @transform_0, window_bounds = array<i64: 64, 128>}, {transform_indices = @transform_1, window_bounds = array<i64: 64, 128>}, {transform_indices = @transform_2, window_bounds = array<i64: 64, 128>}]} {
    %c0 = arith.constant 0 : index
    %c0_0 = arith.constant 0 : index
    %0 = vector.load %arg2[%c0, %c0_0] : memref<64x128xf32, #tpu.memory_space<vmem>>, vector<64x128xf32>
    %c0_1 = arith.constant 0 : index
    %c0_2 = arith.constant 0 : index
    %1 = vector.load %arg3[%c0_1, %c0_2] : memref<64x128xf32, #tpu.memory_space<vmem>>, vector<64x128xf32>
    %2 = arith.addf %0, %1 : vector<64x128xf32>
    %c0_3 = arith.constant 0 : index
    %c0_4 = arith.constant 0 : index
    %3 = vector.load %arg4[%c0_3, %c0_4] : memref<64x128xf32, #tpu.memory_space<vmem>>, vector<64x128xf32>
    tpu.vector_store %arg4[%c0_3, %c0_4], %2 {strides = array<i32>} : memref<64x128xf32, #tpu.memory_space<vmem>>, vector<64x128xf32>,
    return
  }
  func.func @transform_0(%arg0: i32, %arg1: i32) -> (i32, i32) {
    %c1_i32 = arith.constant 1 : i32
    %0 = arith.muli %arg0, %c1_i32 : i32
    %1 = arith.addi %0, %arg1 : i32
    %c0_i32 = arith.constant 0 : i32
    %c0_i32_0 = arith.constant 0 : i32
    return %1, %c0_i32 : i32, i32
  }
  func.func @transform_1(%arg0: i32, %arg1: i32) -> (i32, i32) {
    %c0_i32 = arith.constant 0 : i32
    %c0_i32_0 = arith.constant 0 : i32
    return %arg1, %c0_i32 : i32, i32
  }
  func.func @transform_2(%arg0: i32, %arg1: i32) -> (i32, i32) {
    %c1_i32 = arith.constant 1 : i32
    %0 = arith.muli %arg0, %c1_i32 : i32
    %1 = arith.addi %0, %arg1 : i32
    %c0_i32 = arith.constant 0 : i32
    %c0_i32_0 = arith.constant 0 : i32
    return %1, %c0_i32 : i32, i32
  }
}

</mosaic_0001>

<bundles_post_ra>
// kernel: tpu_custom_call.1
= control target key start
LH: loop header
LB: loop body
LE: loop exit
PB: predicated region body
PF: predicated region fallthrough
CT: control target
= control target key end

     0   :  { %7 = vsyncpa [#allocation3], 0  ;;  %s735_s0 = inlined_call_operand.hbm [shape: f32[128,128], index: 0, kind: input, shape index: {}, may-alias: {0,2}]   ;;  %s736_s1 = inlined_call_operand.vmem [shape: f32[64,128], index: 1, kind: input, shape index: {}]   ;;  %s737_s2 = inlined_call_operand.hbm [shape: f32[128,128], index: 2, kind: output, shape index: {}, may-alias: {0,2}]  }
   0x1   :  { %9 = vsyncpa [#allocation3 + $0x1], 0 }
   0x2   :  { %10 = vsyncpa [#allocation4], 0 }
   0x3   :  { %12 = vsyncpa [#allocation4 + $0x1], 0  ;;  %s565_s9 = smov 0   ;;  %s567_s10 = smov 0  }
   0x4   :  { %s569_s11 = smov 0   ;;  %s571_s12 = smov 0  }
   0x5   :  { %s573_s13 = smov 0   ;;  %s575_s14 = smov 0  }
   0x6 LB: > { %s350_s15 = sadd.s32 4294967295, %s542_s14   ;;  %s351_s16 = sadd.s32 4294967294, %s542_s14   ;;  %s542_s14 = sphi %s575_s14, %s18_s14   ;;  %s538_s13 = sphi %s573_s13, %s748_s13   ;;  %s534_s12 = sphi %s571_s12, %s747_s12   ;;  %s530_s11 = sphi %s569_s11, %s746_s11   ;;  %s526_s10 = sphi %s567_s10, %s745_s10   ;;  %s522_s9 = sphi %s565_s9, %s744_s9  }
   0x7   : > { %s30_s17 = sadd.s32 1, %s538_s13  ;;  %s39_s18 = sadd.s32 1, %s530_s11 }
   0x8   : > { %p32_p0 = scmp.ge.s32.totalorder %s30_s17, 2  ;;  %p46_p1 = scmp.ne.s32.totalorder %s530_s11, %s526_s10 }
   0x9   : > { %p47_p2 = scmp.eq.s32.totalorder %s542_s14, 0  ;;  %p52_p3 = scmp.ne.s32.totalorder %s526_s10, %s522_s9 }
   0xa   : > { %s750_s17 = smov (%p32_p0, %s30_s17), 0  ;;  %p53_p5 = scmp.eq.s32.totalorder %s350_s15, 0 }
   0xb   : > { %p606_p4 = por %p47_p2, %p46_p1  ;;  %s36_s20 = ssub.s32 %s538_s13, %s750_s17 }
   0xc   : > { %p104_p6 = scmp.eq.s32.totalorder %s350_s15, 1  ;;  %p37_p7 = scmp.eq.s32.totalorder %s36_s20, 0 }
   0xd   : > { %p612_p8 = por %p53_p5, %p52_p3  ;;  %p110_p10 = scmp.eq.s32.totalorder %s351_s16, 1 }
   0xe   : > { %p616_p9 = por %p104_p6, %p46_p1  ;;  %p380_p13 = scmp.lt.s32.totalorder %s542_s14, 2 }
   0xf   : > { %s621_s23 = scalar_select %p37_p7, %s530_s11, %s39_s18  }
  0x10   : > { %p623_p11 = por %p110_p10, %p52_p3  ;;  %s139_s25 = sand.u32 1, %s530_s11  }
  0x11   : > { %s355_s26 = sshll.u32 %s139_s25, 6  ;;  %s366_s27 = sshll.u32 %s538_s13, 10 }
  0x12   : > { %s150_s30 = scalar_lea.hbm %s735_s0, %s366_s27  ;;  %s143_s3 = scalar_lea.vmem [#allocation2], %s355_s26 }
  0x13   : > { %s151_s4 = sshll.u32 %s143_s3, 4  ;;  %p636_p0 = pnand %p380_p13, %p606_p4  ;;  %s152_s4 = int_to_ptr.vmem [resolvable:$true] %s151_s4 }
  0x14   : > { %p358_p1 = scmp.ge.s32.totalorder %s542_s14, 1  ;;  %s140_s6 = scalar_lea.sflag [#allocation3], %s139_s25 }
  0x15   : > { %p436_p2 = pneg %p636_p0  ;;  %s447_s7 = scalar_lea.vmem %s152_s4, 1024 }
  0x16   : > { %p448_p3 = scmp.ne.s32.totalorder %s152_s4, %s447_s7  ;;  %s544_s8 = smov [#allocation2]  }
  0x17   : > { %s452_s15 = sshll.u32 %s544_s8, 4  ;;  %s453_s15 = int_to_ptr.vmem [resolvable:$false] %s452_s15 }
  0x18   : > { %p450_p5 = pnand %p448_p3, %p436_p2  ;;  %s454_s16 = scalar_lea.vmem %s453_s15, 2048 }
  0x19   : > { %p455_p7 = scmp.lt.s32.totalorder %s152_s4, %s453_s15  ;;  %p456_p10 = scmp.lt.s32.totalorder %s454_s16, %s447_s7 }
  0x1a   : > { %p451_p6 = pneg %p450_p5 }
  0x1b   : > { %p457_p12 = por %p456_p10, %p455_p7 }
  0x1d   : > { %p458_p4 = pnand %p457_p12, %p451_p6 }
  0x1f   : > { %461 = shalt.err (!%p458_p4)
}
  0x20   : > { %s545_s18 = smov 128   ;;  %s546_s19 = smov 8  }
  0x21   : > { %375 = dma.hbm_to_vmem [thread:$0]  (!%p636_p0), %s150_s30, 1024, %s152_s4, %s140_s6, %s545_s18, %s545_s18, %s546_s19  }
  0x22   : > { %p159_p13 = scmp.lt.s32.totalorder %s542_s14, 3 }
  0x24   : > { %p160_p2 = pnand %p358_p1, %p159_p13 }
  0x25   : > { %s649_s20 = sand.u32 (!%p160_p2), 1, %s526_s10  }
  0x26   : > { %163 = sbr.rel (%p160_p2) target bundleno = 69 (0x45), region = 28  ;;  %s359_s25 = sshll.u32 (!%p160_p2), %s649_s20, 6 }
  0x27   : > { %s166_s26 = scalar_lea.sflag (!%p160_p2), [#allocation3], %s649_s20  ;;  %s169_s27 = scalar_lea.vmem (!%p160_p2), [#allocation2], %s359_s25 }
  0x2b   : > { %513 = dma.done.wait (%p612_p8), %s166_s26, 1024  }
  0x2c   : > { %515 = vsyncadd (%p612_p8), %s166_s26, 4294966272  ;;  %v205_v0 = vld [vmem:[%s169_s27] sm:$0xff]  ;;  %v206_v2 = vld [vmem:[%s169_s27 + $0x8] sm:$0xff]  ;;  %s194_s6 = scalar_lea.vmem [#allocation5], %s359_s25  ;;  %s367_s15 = sshll.u32 %s534_s12, 10 }
  0x2d   : > { %v213_v1 = vld [vmem:[%s736_s1] sm:$0xff]  ;;  %v214_v4 = vld [vmem:[%s736_s1 + $0x8] sm:$0xff]  ;;  %v207_v5 = vld [vmem:[%s169_s27 + $0x10] sm:$0xff]  ;;  %s252_s21 = sshll.u32 %s194_s6, 4  ;;  %s687_s4 = scalar_lea.hbm %s737_s2, %s367_s15  ;;  %s679_s21 = int_to_ptr.vmem [resolvable:$true] %s252_s21 }
  0x2e   : > { %v221_v3 = vadd.f32 %v213_v1, %v205_v0  ;;  %v215_v6 = vld [vmem:[%s736_s1 + $0x10] sm:$0xff]  ;;  %v222_v7 = vadd.f32 %v214_v4, %v206_v2  ;;  %v208_v9 = vld [vmem:[%s169_s27 + $0x18] sm:$0xff]  ;;  %v209_v11 = vld [vmem:[%s169_s27 + $0x20] sm:$0xff]  ;;  %s462_s5 = scalar_lea.vmem %s679_s21, 1024  ;;  %s547_s7 = smov [#allocation5]  }
  0x2f   : > { %v223_v8 = vadd.f32 %v215_v6, %v207_v5  ;;  %v216_v10 = vld [vmem:[%s736_s1 + $0x18] sm:$0xff]  ;;  %v217_v13 = vld [vmem:[%s736_s1 + $0x20] sm:$0xff]  ;;  %v210_v14 = vld [vmem:[%s169_s27 + $0x28] sm:$0xff]  ;;  %p463_p8 = scmp.ne.s32.totalorder %s679_s21, %s462_s5  ;;  %s466_s8 = sshll.u32 %s547_s7, 4  ;;  %s467_s8 = int_to_ptr.vmem [resolvable:$false] %s466_s8 }
  0x30   : > { %229 = vst [vmem:[%s194_s6] sm:$0xff] %v221_v3  ;;  %v224_v12 = vadd.f32 %v216_v10, %v208_v9  ;;  %v218_v15 = vld [vmem:[%s736_s1 + $0x28] sm:$0xff]  ;;  %230 = vst [vmem:[%s194_s6 + $0x8] sm:$0xff] %v222_v7  ;;  %v225_v16 = vadd.f32 %v217_v13, %v209_v11  ;;  %v211_v18 = vld [vmem:[%s169_s27 + $0x30] sm:$0xff]  ;;  %s468_s16 = scalar_lea.vmem %s467_s8, 2048  ;;  %p469_p1 = scmp.lt.s32.totalorder %s679_s21, %s467_s8 }
  0x31   : > { %231 = vst [vmem:[%s194_s6 + $0x10] sm:$0xff] %v223_v8  ;;  %v226_v17 = vadd.f32 %v218_v15, %v210_v14  ;;  %v219_v19 = vld [vmem:[%s736_s1 + $0x30] sm:$0xff]  ;;  %v212_v20 = vld [vmem:[%s169_s27 + $0x38] sm:$0xff]  ;;  %s238_s27 = scalar_lea.sflag [#allocation4], %s649_s20  ;;  %p464_p12 = pnand %p463_p8, %p616_p9 }
  0x32   : > { %232 = vst [vmem:[%s194_s6 + $0x18] sm:$0xff] %v224_v12  ;;  %v227_v21 = vadd.f32 %v219_v19, %v211_v18  ;;  %v220_v22 = vld [vmem:[%s736_s1 + $0x38] sm:$0xff]  ;;  %233 = vst [vmem:[%s194_s6 + $0x20] sm:$0xff] %v225_v16  ;;  %p470_p3 = scmp.lt.s32.totalorder %s468_s16, %s462_s5 }
  0x33   : > { %234 = vst [vmem:[%s194_s6 + $0x28] sm:$0xff] %v226_v17  ;;  %v228_v23 = vadd.f32 %v220_v22, %v212_v20  ;;  %p465_p0 = pneg %p464_p12 }
  0x34   : > { %235 = vst [vmem:[%s194_s6 + $0x30] sm:$0xff] %v227_v21  ;;  %p471_p5 = por %p470_p3, %p469_p1 }
  0x35   : > { %236 = vst [vmem:[%s194_s6 + $0x38] sm:$0xff] %v228_v23 }
  0x36   : > { %p472_p6 = pnand %p471_p5, %p465_p0 }
  0x38   : > { %475 = shalt.err (!%p472_p6)
}
  0x39   : > { %s476_s6 = scalar_lea.hbm %s687_s4, 1024  ;;  %s480_s19 = scalar_lea.hbm %s737_s2, 2048 }
  0x3a   : > { %p477_p7 = scmp.ne.s32.totalorder %s687_s4, %s476_s6  ;;  %p481_p13 = scmp.lt.s32.totalorder %s687_s4, %s737_s2 }
  0x3b   : > { %p482_p2 = scmp.lt.s32.totalorder %s480_s19, %s476_s6 }
  0x3c   : > { %p478_p10 = pnand %p477_p7, %p616_p9 }
  0x3d   : > { %p483_p8 = por %p482_p2, %p481_p13 }
  0x3e   : > { %p479_p4 = pneg %p478_p10 }
  0x40   : > { %p484_p12 = pnand %p483_p8, %p479_p4 }
  0x42   : > { %487 = shalt.err (!%p484_p12)
}
  0x43   : > { %s548_s28 = smov 128   ;;  %s549_s12 = smov 8  }
  0x44   : > { %370 = dma.vmem_to_hbm [thread:$0]  (%p616_p9), %s679_s21, 1024, %s687_s4, %s238_s27, %s548_s28, %s548_s28, %s549_s12  }
  0x45 PF: > { %s267_s29 = sand.u32 1, %s522_s9   ;;  %p743_p0 = scmp.ge.s32.totalorder %s542_s14, 2 }
  0x46   : > { %s268_s30 = scalar_lea.sflag [#allocation4], %s267_s29 }
  0x47   : > { %p377_p1 = pnand %p743_p0, %p623_p11 }
  0x49   : > { %p378_p3 = pneg %p377_p1 }
  0x4b   : > { %517 = dma.done.wait (%p378_p3), %s268_s30, 1024  }
  0x4c   : > { %519 = vsyncadd (%p378_p3), %s268_s30, 4294966272  ;;  %s18_s14 = sadd.s32 1, %s542_s14   ;;  %s744_s9 = smov %s526_s10 }
  0x4d   : > { %p15_p5 = scmp.ge.s32.totalorder %s18_s14, 4   ;;  %s745_s10 = smov %s530_s11 }
  0x4e   : > { %s746_s11 = smov %s621_s23  ;;  %s747_s12 = smov %s538_s13 }
  0x4f   : > { %s748_s13 = smov %s750_s17  ;;  %17 = sbr.rel (!%p15_p5) target bundleno = 6 (0x6), region = 76 }
  0x54   :  { %273 = vsyncpa [#allocation3], 1 }
  0x55   :  { %275 = vsyncpa [#allocation3 + $0x1], 1 }
  0x56   :  { %276 = vsyncpa [#allocation4], 1 }
  0x57   :  { %278 = vsyncpa [#allocation4 + $0x1], 1 }

</bundles_post_ra>
